<compile_context>
chip_gen: v6e
topology: v6e:2x2x1
jax: 0.10.0
libtpu: 0.0.40
codegen_flags: <defaults>
</compile_context>

<pallas_src>
import functools

import jax
import jax.numpy as jnp
from jax.experimental import pallas as pl
from jax.experimental.pallas import tpu as pltpu


def _linear_kernel(x_ref, w_ref, b_ref, o_ref):
    """One (tm, tn) output tile of  o = x @ W^T + b.

    x_ref: (tm, d_model)   activation tile (compute dtype)
    w_ref: (tn, d_model)   weight tile, PyTorch nn.Linear layout (compute dtype)
    b_ref: (1, tn)         bias slice (f32)
    o_ref: (tm, tn)        output tile
    """
    acc = jax.lax.dot_general(
        x_ref[...],
        w_ref[...],
        dimension_numbers=(((1,), (1,)), ((), ())),  # contract d_model with d_model
        preferred_element_type=jnp.float32,          # f32 MXU accumulation
    )
    o_ref[...] = (acc + b_ref[...].astype(jnp.float32)).astype(o_ref.dtype)


def _pick_tm(M):
    """M-tile: multiple of 8 sublanes, ~256 rows, >=2 blocks when feasible."""
    if M >= 512:
        return 256
    if M >= 16 and M % 8 == 0:
        # Split into (at least) two blocks so both v7x TensorCores get work.
        return max(8, ((M // 2) + 7) // 8 * 8)
    return M  # small / non-8-aligned: single block (full-dim exception)


def _pick_tn(d_model, d_llm, w_itemsize):
    """d_llm-tile: only split when the double-buffered W slice would be big."""
    if d_llm % 128 == 0 and 2 * d_model * d_llm * w_itemsize > 8 * (1 << 20):
        return min(1024, d_llm)
    return d_llm


@functools.partial(jax.jit, static_argnames=("tm", "tn", "compute_dtype"))
def reprogramming_layer_forward(target_embedding, weight, bias, *,
                                tm=None, tn=None, compute_dtype=None):
    """y = target_embedding @ weight.T + bias  (nn.Linear semantics).

    target_embedding: (B, L, d_model)
    weight:           (d_llm, d_model)  (PyTorch nn.Linear layout — NOT transposed here)
    bias:             (d_llm,)
    compute_dtype:    e.g. jnp.bfloat16 to halve HBM reads / use bf16 MXU on v6e/v7x
                      (accumulation stays f32; output keeps the input dtype).
    returns:          (B, L, d_llm)
    """
    B, L, d_model = target_embedding.shape
    d_llm, d_model_w = weight.shape
    assert d_model_w == d_model, "weight must be (d_llm, d_model)"

    out_dtype = target_embedding.dtype
    M = B * L

    x2d = target_embedding.reshape(M, d_model)
    w = weight
    if compute_dtype is not None:
        x2d = x2d.astype(compute_dtype)
        w = w.astype(compute_dtype)
    b2d = bias.astype(jnp.float32).reshape(1, d_llm)

    # ---- tile selection (static Python ints) -------------------------------
    if tm is None:
        tm = _pick_tm(M)
    else:
        tm = min(int(tm), M)
        if tm != M:
            tm = max(8, (tm // 8) * 8)          # (8,128) sublane constraint
    if tn is None:
        tn = _pick_tn(d_model, d_llm, jnp.dtype(w.dtype).itemsize)
    else:
        tn = min(int(tn), d_llm)
        if tn != d_llm:
            tn = max(128, (tn // 128) * 128)    # lane-dense stores

    grid = (pl.cdiv(M, tm), pl.cdiv(d_llm, tn))

    # ---- VMEM budget: raise scoped limit only when the tiles need it -------
    x_it = jnp.dtype(x2d.dtype).itemsize
    w_it = jnp.dtype(w.dtype).itemsize
    o_it = jnp.dtype(out_dtype).itemsize
    vmem_est = 2 * (tm * d_model * x_it + tn * d_model * w_it + tn * 4 + tm * tn * o_it)
    vmem_limit = None
    if vmem_est > 12 * (1 << 20):
        vmem_limit = int(min(2 * vmem_est, 64 * (1 << 20)))

    cost = pl.CostEstimate(
        flops=2 * M * d_model * d_llm,
        transcendentals=0,
        bytes_accessed=(x2d.size * x_it + w.size * w_it
                        + b2d.size * 4 + M * d_llm * o_it),
    )

    out = pl.pallas_call(
        _linear_kernel,
        out_shape=jax.ShapeDtypeStruct((M, d_llm), out_dtype),
        grid_spec=pltpu.PrefetchScalarGridSpec(
            num_scalar_prefetch=0,
            grid=grid,
            in_specs=[
                pl.BlockSpec((tm, d_model), lambda i, j: (i, 0)),  # x row tile
                pl.BlockSpec((tn, d_model), lambda i, j: (j, 0)),  # W slice (no transpose)
                pl.BlockSpec((1, tn), lambda i, j: (0, j)),        # bias slice
            ],
            out_specs=pl.BlockSpec((tm, tn), lambda i, j: (i, j)),
        ),
        compiler_params=pltpu.CompilerParams(
            dimension_semantics=("parallel", "parallel"),
            vmem_limit_bytes=vmem_limit,
        ),
        cost_estimate=cost,
    )(x2d, w, b2d)

    return out.reshape(B, L, d_llm)


def init_params(key, d_model, d_llm):
    """Deterministic nn.Linear-style init (uniform +/- 1/sqrt(d_model))."""
    kw, kb = jax.random.split(key)
    bound = 1.0 / (d_model ** 0.5)
    weight = jax.random.uniform(kw, (d_llm, d_model), jnp.float32, -bound, bound)
    bias = jax.random.uniform(kb, (d_llm,), jnp.float32, -bound, bound)
    return weight, bias


if __name__ == "__main__":
    key = jax.random.PRNGKey(0)
    k_x, k_p = jax.random.split(key)

    B, L, d_model, d_llm = 2, 8, 32, 64
    target_embedding = jax.random.normal(k_x, (B, L, d_model), jnp.float32)
    weight, bias = init_params(k_p, d_model, d_llm)

    # Reference (same math as the PyTorch module, plain JAX).
    y_ref = target_embedding @ weight.T + bias

    # f32 path: exact semantics of the original module.
    y = reprogramming_layer_forward(target_embedding, weight, bias)
    y = jax.block_until_ready(y)
    assert y.shape == (B, L, d_llm)
    assert jnp.allclose(y, y_ref, atol=1e-5, rtol=1e-5)

    # bf16 compute path (v6e/v7x fast path): bf16 reads/MXU, f32 accumulation.
    y_bf16 = reprogramming_layer_forward(
        target_embedding, weight, bias, compute_dtype=jnp.bfloat16)
    y_bf16 = jax.block_until_ready(y_bf16)
    assert y_bf16.shape == (B, L, d_llm)
    assert jnp.allclose(y_bf16, y_ref, atol=5e-2, rtol=5e-2)

    print("KERNEL_OK")
</pallas_src>

<mosaic_0001>
module attributes {stable_mosaic.version = 11 : i64} {
  func.func @_linear_kernel(%arg0: i32, %arg1: i32, %arg2: memref<8x32xf32, #tpu.memory_space<vmem>>, %arg3: memref<64x32xf32, #tpu.memory_space<vmem>>, %arg4: memref<1x64xf32, #tpu.memory_space<vmem>>, %arg5: memref<8x64xf32, #tpu.memory_space<vmem>>) attributes {dimension_semantics = [#tpu.dimension_semantics<parallel>, #tpu.dimension_semantics<parallel>], iteration_bounds = array<i64: 2, 1>, scalar_prefetch = 0 : i64, scratch_operands = 0 : i64, tpu.core_type = #tpu.core_type<tc>, window_params = [{transform_indices = @transform_0, window_bounds = array<i64: 8, 32>}, {transform_indices = @transform_1, window_bounds = array<i64: 64, 32>}, {transform_indices = @transform_2, window_bounds = array<i64: 1, 64>}, {transform_indices = @transform_3, window_bounds = array<i64: 8, 64>}]} {
    %c0 = arith.constant 0 : index
    %c0_0 = arith.constant 0 : index
    %0 = vector.load %arg2[%c0, %c0_0] : memref<8x32xf32, #tpu.memory_space<vmem>>, vector<8x32xf32>
    %c0_1 = arith.constant 0 : index
    %c0_2 = arith.constant 0 : index
    %1 = vector.load %arg3[%c0_1, %c0_2] : memref<64x32xf32, #tpu.memory_space<vmem>>, vector<64x32xf32>
    %cst = arith.constant dense<0.000000e+00> : vector<8x64xf32>
    %2 = tpu.matmul %0, %1, %cst {dimension_numbers = #tpu.dot_dimension_numbers<[1], [1], [0], [0], [0, 0, 1, 0], [], []>} : vector<8x32xf32>, vector<64x32xf32>, vector<8x64xf32> -> vector<8x64xf32>
    %c0_3 = arith.constant 0 : index
    %c0_4 = arith.constant 0 : index
    %3 = vector.load %arg4[%c0_3, %c0_4] : memref<1x64xf32, #tpu.memory_space<vmem>>, vector<1x64xf32>
    %4 = vector.broadcast %3 : vector<1x64xf32> to vector<8x64xf32>
    %5 = arith.addf %2, %4 : vector<8x64xf32>
    %c0_5 = arith.constant 0 : index
    %c0_6 = arith.constant 0 : index
    %6 = vector.load %arg5[%c0_5, %c0_6] : memref<8x64xf32, #tpu.memory_space<vmem>>, vector<8x64xf32>
    tpu.vector_store %arg5[%c0_5, %c0_6], %5 {strides = array<i32>} : memref<8x64xf32, #tpu.memory_space<vmem>>, vector<8x64xf32>,
    return
  }
  func.func @transform_0(%arg0: i32, %arg1: i32) -> (i32, i32) {
    %c0_i32 = arith.constant 0 : i32
    %c0_i32_0 = arith.constant 0 : i32
    return %arg0, %c0_i32 : i32, i32
  }
  func.func @transform_1(%arg0: i32, %arg1: i32) -> (i32, i32) {
    %c0_i32 = arith.constant 0 : i32
    %c0_i32_0 = arith.constant 0 : i32
    return %arg1, %c0_i32 : i32, i32
  }
  func.func @transform_2(%arg0: i32, %arg1: i32) -> (i32, i32) {
    %c0_i32 = arith.constant 0 : i32
    %c0_i32_0 = arith.constant 0 : i32
    return %c0_i32, %arg1 : i32, i32
  }
  func.func @transform_3(%arg0: i32, %arg1: i32) -> (i32, i32) {
    %c0_i32 = arith.constant 0 : i32
    return %arg0, %arg1 : i32, i32
  }
}

</mosaic_0001>

<bundles_post_ra>
// kernel: reprogramming_layer_forward.1
= control target key start
LH: loop header
LB: loop body
LE: loop exit
PB: predicated region body
PF: predicated region fallthrough
CT: control target
= control target key end

     0   :  { %8 = vsyncpa [#allocation3], 0  ;;  %s792_s0 = inlined_call_operand.vmem [shape: f32[16,32], index: 0, kind: input, shape index: {}]   ;;  %s793_s1 = inlined_call_operand.vmem [shape: f32[64,32], index: 1, kind: input, shape index: {}]   ;;  %s794_s2 = inlined_call_operand.vmem [shape: f32[1,64], index: 2, kind: input, shape index: {}]   ;;  %s795_s3 = inlined_call_operand.hbm [shape: f32[16,64], index: 3, kind: output, shape index: {}]  }
   0x1   :  { %10 = vsyncpa [#allocation3 + $0x1], 0  ;;  %s651_s12 = smov 0   ;;  %s653_s13 = smov 0  }
   0x2   :  { %s655_s14 = smov 0   ;;  %s657_s15 = smov 0  }
   0x3   :  { %s659_s16 = smov 0   ;;  %s661_s17 = smov 0  }
   0x4 LB: > { %s442_s18 = sadd.s32 4294967295, %s626_s17   ;;  %s443_s19 = sadd.s32 4294967294, %s626_s17   ;;  %s626_s17 = sphi %s661_s17, %s16_s17   ;;  %s622_s16 = sphi %s659_s16, %s802_s16   ;;  %s618_s15 = sphi %s657_s15, %s801_s15   ;;  %s614_s14 = sphi %s655_s14, %s800_s14   ;;  %s610_s13 = sphi %s653_s13, %s799_s13   ;;  %s606_s12 = sphi %s651_s12, %s798_s12  }
   0x5   : > { %s28_s20 = sadd.s32 1, %s622_s16  ;;  %s115_s21 = sadd.s32 1, %s614_s14 }
   0x6   : > { %p30_p0 = scmp.ge.s32.totalorder %s28_s20, 2  ;;  %p125_p1 = scmp.ne.s32.totalorder %s614_s14, %s610_s13 }
   0x7   : > { %p126_p2 = scmp.eq.s32.totalorder %s442_s18, 1  ;;  %p131_p3 = scmp.ne.s32.totalorder %s610_s13, %s606_s12 }
   0x8   : > { %s804_s20 = smov (%p30_p0, %s28_s20), 0  ;;  %p132_p5 = scmp.eq.s32.totalorder %s443_s19, 1 }
   0x9   : > { %p691_p4 = por %p126_p2, %p125_p1  ;;  %s110_s23 = ssub.s32 %s622_s16, %s804_s20 }
   0xa   : > { %p448_p6 = scmp.ge.s32.totalorder %s626_s17, 1  ;;  %p113_p7 = scmp.eq.s32.totalorder %s110_s23, 0 }
   0xb   : > { %p698_p8 = por %p132_p5, %p131_p3  ;;  %p172_p9 = scmp.lt.s32.totalorder %s626_s17, 3 }
   0xc   : > { %s704_s25 = scalar_select %p113_p7, %s614_s14, %s115_s21  }
   0xd   : > { %p173_p10 = pnand %p448_p6, %p172_p9 }
   0xe   : > { %p203_p11 = scmp.lt.s32.totalorder (!%p173_p10), %s618_s15, 1  ;;  %s200_s30 = sand.u32 (!%p173_p10), 1, %s610_s13  }
   0xf   : > { %176 = sbr.rel (%p173_p10) target bundleno = 261 (0x105), region = 32  ;;  %s449_s4 = sshll.u32 (!%p173_p10), %s200_s30, 3 }
  0x10   : > { %s462_s7 = sshll.u32 (!%p173_p10), %s618_s15, 7  ;;  %s202_s8 = scalar_lea.vmem (!%p173_p10), [#allocation2], %s449_s4 }
  0x11   : > { %s347_s9 = sshll.u32 (!%p173_p10), %s202_s8, 4  ;;  %s752_s18 = scalar_lea.hbm (!%p173_p10), %s795_s3, %s462_s7  ;;  %s348_s9 = int_to_ptr.vmem [resolvable:$true] %s347_s9 }
  0x12   : > { %s333_s19 = scalar_lea.sflag (!%p173_p10), [#allocation3], %s200_s30 }
  0x14   : > { %v224_v0 = vld [vmem:[%s793_s1 + $0x38] sm:$0xff]  ;;  %vm232_vm0 = vcmask 261120   ;;  %v628_v1 = vmov 0.0   ;;  %vm629_vm1 = vmmov 0   ;;  %v223_v2 = vld [vmem:[%s793_s1 + $0x30] sm:$0xff]  ;;  %v222_v3 = vld [vmem:[%s793_s1 + $0x28] sm:$0xff] }
  0x15   : > { %474 = vmatprep.subr.mxu0 %v628_v1  ;;  %490 = vmatprep.mubr.msk.f32.mxu0 %vm629_vm1, %v628_v1  ;;  %v221_v4 = vld [vmem:[%s793_s1 + $0x20] sm:$0xff]  ;;  %v220_v5 = vld [vmem:[%s793_s1 + $0x18] sm:$0xff]  ;;  %v219_v6 = vld [vmem:[%s793_s1 + $0x10] sm:$0xff]  ;;  %s204_s11 = scalar_select %p203_p11, %s618_s15, 1  ;;  %vm330_vm2 = vcmask 523264  }
  0x16   : > { %475 = vmatpush3.xpose.msk.msra.mxu0 %vm232_vm0, %v224_v0  ;;  %v218_v7 = vld [vmem:[%s793_s1 + $0x8] sm:$0xff]  ;;  %v217_v8 = vld [vmem:[%s793_s1] sm:$0xff]  ;;  %s630_s15 = smov [#allocation2]  }
  0x17   : > { %476 = vmatprep.subr.mxu0 %v628_v1  ;;  %s450_s21 = sshll.u32 %s204_s11, 3  ;;  %v451_v10 = vld [vmem:[%s794_s2] ss:$0 sm:$0xff]  ;;  %s554_s23 = sshll.u32 %s630_s15, 4  ;;  %s555_s23 = int_to_ptr.vmem [resolvable:$false] %s554_s23 }
  0x18   : > { %s206_s29 = scalar_lea.vmem %s792_s0, %s450_s21  ;;  %s550_s21 = scalar_lea.vmem %s348_s9, 128 }
  0x19   : > { %v216_v9 = vld [vmem:[%s206_s29] sm:$0xff]  ;;  %p551_p12 = scmp.ne.s32.totalorder %s348_s9, %s550_s21  ;;  %s556_s26 = scalar_lea.vmem %s555_s23, 256 }
  0x1a   : > { %477 = vmatpush3.xpose.msk.msra.mxu0 %vm232_vm0, %v223_v2  ;;  %p557_p1 = scmp.lt.s32.totalorder %s348_s9, %s555_s23  ;;  %p558_p2 = scmp.lt.s32.totalorder %s556_s26, %s550_s21 }
  0x1b   : > { %478 = vmatprep.subr.mxu0 %v628_v1  ;;  %p552_p13 = pnand %p551_p12, %p691_p4 }
  0x1c   : > { %p559_p3 = por %p558_p2, %p557_p1 }
  0x1d   : > { %p553_p0 = pneg %p552_p13 }
  0x1e   : > { %479 = vmatpush3.xpose.msk.msra.mxu0 %vm232_vm0, %v222_v3 }
  0x1f   : > { %480 = vmatprep.subr.mxu0 %v628_v1  ;;  %p560_p5 = pnand %p559_p3, %p553_p0 }
  0x22   : > { %481 = vmatpush3.xpose.msk.msra.mxu0 %vm232_vm0, %v221_v4 }
  0x23   : > { %482 = vmatprep.subr.mxu0 %v628_v1 }
  0x26   : > { %483 = vmatpush3.xpose.msk.msra.mxu0 %vm232_vm0, %v220_v5 }
  0x27   : > { %484 = vmatprep.subr.mxu0 %v628_v1 }
  0x2a   : > { %485 = vmatpush3.xpose.msk.msra.mxu0 %vm232_vm0, %v219_v6 }
  0x2b   : > { %486 = vmatprep.subr.mxu0 %v628_v1 }
  0x2e   : > { %487 = vmatpush3.xpose.msk.msra.mxu0 %vm232_vm0, %v218_v7 }
  0x2f   : > { %488 = vmatprep.subr.mxu0 %v628_v1 }
  0x32   : > { %489 = vmatpush3.xpose.msk.msra.mxu0 %vm232_vm0, %v217_v8 }
  0x35   : > { %491 = vmatmul.mubr.msk.f32.vlgmr.msra.gmra.mxu0 %vm232_vm0, %v216_v9 }
  0xf5   : > { %v326_v11 = vpop.f32.mrf.mxu0 }
  0xf6   : > { %v327_v12 = vadd.f32 %v451_v10, %v326_v11 }
  0xf7   : > { %v492_v13 = vpop.f32.mrf.mxu0 }
  0xf8   : > { %331 = vst.msk [vmem:[%s202_s8] sm:$0xff] %vm330_vm2, %v327_v12 }
  0xf9   : > { %563 = shalt.err (!%p560_p5)
}
  0xfa   : > { %s564_s27 = scalar_lea.hbm %s752_s18, 128  ;;  %s568_s30 = scalar_lea.hbm %s795_s3, 256 }
  0xfb   : > { %p565_p6 = scmp.ne.s32.totalorder %s752_s18, %s564_s27  ;;  %p569_p10 = scmp.lt.s32.totalorder %s752_s18, %s795_s3 }
  0xfc   : > { %p570_p11 = scmp.lt.s32.totalorder %s568_s30, %s564_s27 }
  0xfd   : > { %p566_p7 = pnand %p565_p6, %p691_p4 }
  0xfe   : > { %p571_p12 = por %p570_p11, %p569_p10 }
  0xff   : > { %p567_p9 = pneg %p566_p7 }
 0x101   : > { %p572_p13 = pnand %p571_p12, %p567_p9 }
 0x103   : > { %575 = shalt.err (!%p572_p13)
}
 0x104   : > { %493 = dma.vmem_to_hbm [thread:$0]  (%p691_p4), %s348_s9, 128, %s752_s18, %s333_s19  }
 0x105 PF: > { %p499_p0 = scmp.ge.s32.totalorder %s626_s17, 2  ;;  %s359_s6 = sand.u32 1, %s606_s12  }
 0x106   : > { %s360_s7 = scalar_lea.sflag [#allocation3], %s359_s6 }
 0x107   : > { %p496_p1 = pnand %p499_p0, %p698_p8 }
 0x109   : > { %p497_p2 = pneg %p496_p1 }
 0x10b   : > { %601 = dma.done.wait (%p497_p2), %s360_s7, 128  }
 0x10c   : > { %603 = vsyncadd (%p497_p2), %s360_s7, 4294967168  ;;  %s16_s17 = sadd.s32 1, %s626_s17   ;;  %s798_s12 = smov %s610_s13 }
 0x10d   : > { %p13_p3 = scmp.ge.s32.totalorder %s16_s17, 4   ;;  %s799_s13 = smov %s614_s14 }
 0x10e   : > { %s800_s14 = smov %s704_s25  ;;  %s801_s15 = smov %s622_s16 }
 0x10f   : > { %s802_s16 = smov %s804_s20  ;;  %15 = sbr.rel (!%p13_p3) target bundleno = 4 (0x4), region = 73 }
 0x114   :  { %365 = vsyncpa [#allocation3], 1 }
 0x115   :  { %367 = vsyncpa [#allocation3 + $0x1], 1 }

</bundles_post_ra>
